<compile_context>
chip_gen: v7x
topology: tpu7x:2x2x1
jax: 0.10.0
libtpu: 0.0.40
codegen_flags: <defaults>
</compile_context>

<pallas_src>
import jax
import jax.numpy as jnp
from jax import lax
from jax.experimental import pallas as pl
from jax.experimental.pallas import tpu as pltpu


def _value_kernel(x_ref, w1_ref, b1_ref, w2_ref, b2_ref, w3_ref, b3_ref, o_ref):
    """One batch tile.

    x_ref : (tb, S)  float32  (natural batch-major layout from HBM)
    wN_ref: (out, in) float32 (PyTorch layout; resident across the grid)
    bN_ref: (out, 1)  float32
    o_ref : (1, tb)   float32 (batch on the lane axis -> dense stores)
    """
    # fc1 + ReLU: contract the S axis of both operands -> (H, tb).
    # Mosaic folds the (tb, S) -> (S, tb) transpose into the matmul feed.
    h = lax.dot_general(
        w1_ref[...], x_ref[...],
        dimension_numbers=(((1,), (1,)), ((), ())),
        preferred_element_type=jnp.float32)
    h = jnp.maximum(h + b1_ref[...], 0.0)

    # fc2 + ReLU  (H, H) @ (H, tb) -> (H, tb)
    h = jnp.dot(w2_ref[...], h, preferred_element_type=jnp.float32)
    h = jnp.maximum(h + b2_ref[...], 0.0)

    # fc3 (no activation)  (1, H) @ (H, tb) -> (1, tb)
    out = jnp.dot(w3_ref[...], h, preferred_element_type=jnp.float32)
    o_ref[...] = (out + b3_ref[...]).astype(o_ref.dtype)


def _pick_tile(batch, block_b):
    """Batch tile: whole batch for tiny inputs, else a lane-dense multiple of
    128 capped at block_b and at ceil(B/2) (so the grid has >=2 steps and the
    "parallel" axis can shard across v7x's two TensorCores)."""
    if batch <= min(block_b, 256):
        return batch
    tb = min(block_b, -(-batch // 2))
    return max(128, (tb // 128) * 128)


def value_forward(state, params, *, block_b=8192):
    """state: (B, state_size) float32 -> (B, 1) float32.

    params: PyTorch-layout (w1 (H,S), b1 (H,1), w2 (H,H), b2 (H,1),
    w3 (1,H), b3 (1,1)).  Everything runs in float32.
    """
    w1, b1, w2, b2, w3, b3 = params
    B, S = state.shape
    H = w1.shape[0]

    xf = state.astype(jnp.float32)
    w1f, w2f, w3f = (w.astype(jnp.float32) for w in (w1, w2, w3))
    b1f, b2f, b3f = (b.astype(jnp.float32) for b in (b1, b2, b3))

    tb = _pick_tile(B, block_b)
    grid = (pl.cdiv(B, tb),)

    # Weights/biases: full block, constant index_map -> DMA'd once, resident.
    def resident(a):
        return pl.BlockSpec(a.shape, lambda i: (0, 0))

    flops = 2 * B * (S * H + H * H + H)
    bytes_accessed = (B * S * 4 + B * 4                 # streamed in / out
                      + (S * H + H * H + H) * 4          # weights
                      + (2 * H + 1) * 4)                 # biases

    out_t = pl.pallas_call(
        _value_kernel,
        out_shape=jax.ShapeDtypeStruct((1, B), jnp.float32),
        grid_spec=pltpu.PrefetchScalarGridSpec(
            num_scalar_prefetch=0,
            grid=grid,
            in_specs=[
                pl.BlockSpec((tb, S), lambda i: (i, 0)),  # streamed activations
                resident(w1f), resident(b1f),
                resident(w2f), resident(b2f),
                resident(w3f), resident(b3f),
            ],
            out_specs=pl.BlockSpec((1, tb), lambda i: (0, i)),
        ),
        compiler_params=pltpu.CompilerParams(
            # Batch tiles are independent -> shard across TCs on v7x.
            dimension_semantics=("parallel",),
        ),
        cost_estimate=pl.CostEstimate(
            flops=flops, transcendentals=0, bytes_accessed=bytes_accessed),
    )(xf, w1f, b1f, w2f, b2f, w3f, b3f)

    # (1, B) -> (B, 1): identical flat layout, pure metadata reshape.
    return out_t.reshape(B, 1)


def init_params(key, state_size, hidden_size=32):
    """PyTorch nn.Linear-style init: weights (out, in), biases (out, 1)."""
    keys = jax.random.split(key, 6)

    def linear(kw, kb, fan_in, fan_out):
        bound = 1.0 / jnp.sqrt(jnp.float32(fan_in))
        w = jax.random.uniform(kw, (fan_out, fan_in), jnp.float32, -bound, bound)
        b = jax.random.uniform(kb, (fan_out, 1), jnp.float32, -bound, bound)
        return w, b

    w1, b1 = linear(keys[0], keys[1], state_size, hidden_size)
    w2, b2 = linear(keys[2], keys[3], hidden_size, hidden_size)
    w3, b3 = linear(keys[4], keys[5], hidden_size, 1)
    return (w1, b1, w2, b2, w3, b3)


def value_reference(state, params):
    """Pure-JAX f32 reference matching the PyTorch module."""
    w1, b1, w2, b2, w3, b3 = params
    h = jnp.maximum(state @ w1.T + b1.T, 0.0)
    h = jnp.maximum(h @ w2.T + b2.T, 0.0)
    return h @ w3.T + b3.T


if __name__ == "__main__":
    key = jax.random.PRNGKey(0)
    k_params, k_state = jax.random.split(key)

    state_size, hidden_size = 16, 32
    params = init_params(k_params, state_size, hidden_size)

    # Small-shape smoke test (single whole-batch tile).
    batch = 8
    state = jax.random.normal(k_state, (batch, state_size), jnp.float32)
    ref = value_reference(state, params)
    out = jax.block_until_ready(value_forward(state, params))
    assert out.shape == (batch, 1), out.shape
    assert jnp.allclose(out, ref, atol=1e-4, rtol=1e-4), "small-batch mismatch"

    # Multi-tile path with block_b=128 (grid of 3) and a non-dividing batch
    # (200 -> masked tail tile).
    for big_batch in (384, 200):
        big_state = jax.random.normal(k_state, (big_batch, state_size),
                                      jnp.float32)
        big_ref = value_reference(big_state, params)
        big_out = jax.block_until_ready(
            value_forward(big_state, params, block_b=128))
        assert big_out.shape == (big_batch, 1), big_out.shape
        assert jnp.allclose(big_out, big_ref, atol=1e-4, rtol=1e-4), big_batch

    # Large-tile path with the default block_b: the >=2-step clamp gives
    # tb=2048, grid=(2,).
    prod_batch = 4096
    prod_state = jax.random.normal(k_state, (prod_batch, state_size),
                                   jnp.float32)
    prod_ref = value_reference(prod_state, params)
    prod_out = jax.block_until_ready(value_forward(prod_state, params))
    assert prod_out.shape == (prod_batch, 1), prod_out.shape
    assert jnp.allclose(prod_out, prod_ref, atol=1e-4, rtol=1e-4), "prod mismatch"

    print("KERNEL_OK")
</pallas_src>

<mosaic_0001>
module attributes {stable_mosaic.version = 11 : i64} {
  func.func @_value_kernel(%arg0: i32, %arg1: memref<8x16xf32, #tpu.memory_space<vmem>>, %arg2: memref<32x16xf32, #tpu.memory_space<vmem>>, %arg3: memref<32x1xf32, #tpu.memory_space<vmem>>, %arg4: memref<32x32xf32, #tpu.memory_space<vmem>>, %arg5: memref<32x1xf32, #tpu.memory_space<vmem>>, %arg6: memref<1x32xf32, #tpu.memory_space<vmem>>, %arg7: memref<1x1xf32, #tpu.memory_space<vmem>>, %arg8: memref<1x8xf32, #tpu.memory_space<vmem>>) attributes {dimension_semantics = [#tpu.dimension_semantics<parallel>], iteration_bounds = array<i64: 1>, scalar_prefetch = 0 : i64, scratch_operands = 0 : i64, tpu.core_type = #tpu.core_type<tc>, window_params = [{transform_indices = @transform_0, window_bounds = array<i64: 8, 16>}, {pipeline_mode = #tpu.pipeline_mode<synchronous>, transform_indices = @transform_1, window_bounds = array<i64: 32, 16>}, {pipeline_mode = #tpu.pipeline_mode<synchronous>, transform_indices = @transform_2, window_bounds = array<i64: 32, 1>}, {pipeline_mode = #tpu.pipeline_mode<synchronous>, transform_indices = @transform_3, window_bounds = array<i64: 32, 32>}, {pipeline_mode = #tpu.pipeline_mode<synchronous>, transform_indices = @transform_4, window_bounds = array<i64: 32, 1>}, {pipeline_mode = #tpu.pipeline_mode<synchronous>, transform_indices = @transform_5, window_bounds = array<i64: 1, 32>}, {pipeline_mode = #tpu.pipeline_mode<synchronous>, transform_indices = @transform_6, window_bounds = array<i64: 1, 1>}, {transform_indices = @transform_7, window_bounds = array<i64: 1, 8>}]} {
    %c0 = arith.constant 0 : index
    %c0_0 = arith.constant 0 : index
    %0 = vector.load %arg2[%c0, %c0_0] : memref<32x16xf32, #tpu.memory_space<vmem>>, vector<32x16xf32>
    %c0_1 = arith.constant 0 : index
    %c0_2 = arith.constant 0 : index
    %1 = vector.load %arg1[%c0_1, %c0_2] : memref<8x16xf32, #tpu.memory_space<vmem>>, vector<8x16xf32>
    %cst = arith.constant dense<0.000000e+00> : vector<32x8xf32>
    %2 = tpu.matmul %0, %1, %cst {dimension_numbers = #tpu.dot_dimension_numbers<[1], [1], [0], [0], [0, 0, 1, 0], [], []>} : vector<32x16xf32>, vector<8x16xf32>, vector<32x8xf32> -> vector<32x8xf32>
    %c0_3 = arith.constant 0 : index
    %c0_4 = arith.constant 0 : index
    %3 = vector.load %arg3[%c0_3, %c0_4] : memref<32x1xf32, #tpu.memory_space<vmem>>, vector<32x1xf32>
    %4 = vector.broadcast %3 : vector<32x1xf32> to vector<32x8xf32>
    %5 = arith.addf %2, %4 : vector<32x8xf32>
    %cst_5 = arith.constant 0.000000e+00 : f32
    %6 = vector.broadcast %cst_5 : f32 to vector<32x8xf32>
    %7 = arith.maximumf %5, %6 : vector<32x8xf32>
    %c0_6 = arith.constant 0 : index
    %c0_7 = arith.constant 0 : index
    %8 = vector.load %arg4[%c0_6, %c0_7] : memref<32x32xf32, #tpu.memory_space<vmem>>, vector<32x32xf32>
    %cst_8 = arith.constant dense<0.000000e+00> : vector<32x8xf32>
    %9 = tpu.matmul %8, %7, %cst_8 {dimension_numbers = #tpu.dot_dimension_numbers<[1], [0], [0], [1], [0, 0, 1, 1], [], []>} : vector<32x32xf32>, vector<32x8xf32>, vector<32x8xf32> -> vector<32x8xf32>
    %c0_9 = arith.constant 0 : index
    %c0_10 = arith.constant 0 : index
    %10 = vector.load %arg5[%c0_9, %c0_10] : memref<32x1xf32, #tpu.memory_space<vmem>>, vector<32x1xf32>
    %11 = vector.broadcast %10 : vector<32x1xf32> to vector<32x8xf32>
    %12 = arith.addf %9, %11 : vector<32x8xf32>
    %cst_11 = arith.constant 0.000000e+00 : f32
    %13 = vector.broadcast %cst_11 : f32 to vector<32x8xf32>
    %14 = arith.maximumf %12, %13 : vector<32x8xf32>
    %c0_12 = arith.constant 0 : index
    %c0_13 = arith.constant 0 : index
    %15 = vector.load %arg6[%c0_12, %c0_13] : memref<1x32xf32, #tpu.memory_space<vmem>>, vector<1x32xf32>
    %cst_14 = arith.constant dense<0.000000e+00> : vector<1x8xf32>
    %16 = tpu.matmul %15, %14, %cst_14 {dimension_numbers = #tpu.dot_dimension_numbers<[1], [0], [0], [1], [0, 0, 1, 1], [], []>} : vector<1x32xf32>, vector<32x8xf32>, vector<1x8xf32> -> vector<1x8xf32>
    %c0_15 = arith.constant 0 : index
    %c0_16 = arith.constant 0 : index
    %17 = vector.load %arg7[%c0_15, %c0_16] : memref<1x1xf32, #tpu.memory_space<vmem>>, vector<1x1xf32>
    %18 = vector.broadcast %17 : vector<1x1xf32> to vector<1x8xf32>
    %19 = arith.addf %16, %18 : vector<1x8xf32>
    %c0_17 = arith.constant 0 : index
    %c0_18 = arith.constant 0 : index
    %20 = vector.load %arg8[%c0_17, %c0_18] : memref<1x8xf32, #tpu.memory_space<vmem>>, vector<1x8xf32>
    tpu.vector_store %arg8[%c0_17, %c0_18], %19 {strides = array<i32>} : memref<1x8xf32, #tpu.memory_space<vmem>>, vector<1x8xf32>,
    return
  }
  func.func @transform_0(%arg0: i32) -> (i32, i32) {
    %c0_i32 = arith.constant 0 : i32
    %c0_i32_0 = arith.constant 0 : i32
    return %arg0, %c0_i32 : i32, i32
  }
  func.func @transform_1(%arg0: i32) -> (i32, i32) {
    %c0_i32 = arith.constant 0 : i32
    %c0_i32_0 = arith.constant 0 : i32
    %c0_i32_1 = arith.constant 0 : i32
    return %c0_i32, %c0_i32_0 : i32, i32
  }
  func.func @transform_2(%arg0: i32) -> (i32, i32) {
    %c0_i32 = arith.constant 0 : i32
    %c0_i32_0 = arith.constant 0 : i32
    %c0_i32_1 = arith.constant 0 : i32
    return %c0_i32, %c0_i32_0 : i32, i32
  }
  func.func @transform_3(%arg0: i32) -> (i32, i32) {
    %c0_i32 = arith.constant 0 : i32
    %c0_i32_0 = arith.constant 0 : i32
    %c0_i32_1 = arith.constant 0 : i32
    return %c0_i32, %c0_i32_0 : i32, i32
  }
  func.func @transform_4(%arg0: i32) -> (i32, i32) {
    %c0_i32 = arith.constant 0 : i32
    %c0_i32_0 = arith.constant 0 : i32
    %c0_i32_1 = arith.constant 0 : i32
    return %c0_i32, %c0_i32_0 : i32, i32
  }
  func.func @transform_5(%arg0: i32) -> (i32, i32) {
    %c0_i32 = arith.constant 0 : i32
    %c0_i32_0 = arith.constant 0 : i32
    %c0_i32_1 = arith.constant 0 : i32
    return %c0_i32, %c0_i32_0 : i32, i32
  }
  func.func @transform_6(%arg0: i32) -> (i32, i32) {
    %c0_i32 = arith.constant 0 : i32
    %c0_i32_0 = arith.constant 0 : i32
    %c0_i32_1 = arith.constant 0 : i32
    return %c0_i32, %c0_i32_0 : i32, i32
  }
  func.func @transform_7(%arg0: i32) -> (i32, i32) {
    %c0_i32 = arith.constant 0 : i32
    %c0_i32_0 = arith.constant 0 : i32
    return %c0_i32, %arg0 : i32, i32
  }
}

</mosaic_0001>

<bundles_post_ra>
// kernel: tpu_custom_call.1
= control target key start
LH: loop header
LB: loop body
LE: loop exit
PB: predicated region body
PF: predicated region fallthrough
CT: control target
= control target key end

     0   :  { %s624_s0 = inlined_call_operand.vmem [shape: f32[8,16], index: 0, kind: input, shape index: {}]   ;;  %s625_s1 = inlined_call_operand.vmem [shape: f32[32,16], index: 1, kind: input, shape index: {}]   ;;  %s626_s2 = inlined_call_operand.vmem [shape: f32[32,1], index: 2, kind: input, shape index: {}]   ;;  %s627_s3 = inlined_call_operand.vmem [shape: f32[32,32], index: 3, kind: input, shape index: {}]   ;;  %s628_s4 = inlined_call_operand.vmem [shape: f32[32,1], index: 4, kind: input, shape index: {}]   ;;  %s629_s5 = inlined_call_operand.vmem [shape: f32[1,32], index: 5, kind: input, shape index: {}]   ;;  %s630_s6 = inlined_call_operand.<no memory space> [shape: f32[1,1], index: 6, kind: input, shape index: {}]   ;;  %s631_s7 = inlined_call_operand.hbm [shape: f32[1,8], index: 7, kind: output, shape index: {}]  }
   0x1   :  { %v12_v0 = vstv %s630_s6 }
   0x2   :  { %13 = vst [vmem:[#allocation2] sm:$0x1] %v12_v0 }
   0x3   :  { %v33_v1 = vld [vmem:[%s624_s0] sm:$0xff]  ;;  %vm58_vm0 = vcmask 130048   ;;  %v30_v4 = vld [vmem:[%s625_s1 + $0x8] sm:$0xff]  ;;  %v499_v5 = vmov 0   ;;  %v36_v6 = vld [vmem:[%s626_s2 + $0x10] sm:$0xff] }
   0x4   :  { %v29_v2 = vld [vmem:[%s625_s1] sm:$0xff]  ;;  %421 = vmatprep.subr.msk.mxu0 %vm58_vm0, %v33_v1  ;;  %473 = vset.pattern.permute.xlu0 %v499_v5  ;;  %v31_v7 = vld [vmem:[%s625_s1 + $0x10] sm:$0xff]  ;;  %v35_v8 = vld [vmem:[%s626_s2 + $0x8] sm:$0xff] }
   0x5   :  { %423 = vmatprep.mubr.msk.f32.mxu0 %vm58_vm0, %v29_v2  ;;  %v34_v3 = vld [vmem:[%s626_s2] sm:$0xff]  ;;  %422 = vmatpush3.xpose.msk.msra.mxu0 %vm58_vm0, %v33_v1 }
   0x6   :  { %40 = vperm.xlu0 %473, %v34_v3   ;;  %474 = vset.pattern.permute.xlu1 %v499_v5 }
   0x7   :  { %50 = vperm.xlu1 %474, %v36_v6  }
   0x8   :  { %14 = vsyncpa [#allocation4], 0  ;;  %424 = vmatmul.mubr.msk.f32.vlgmr.msra.gmra.mrb[0].mxu0 %vm58_vm0, %v30_v4  ;;  %v37_v9 = vld [vmem:[%s626_s2 + $0x18] sm:$0xff]  ;;  %v167_v11 = vld [vmem:[%s628_s4] sm:$0xff]  ;;  %vm191_vm1 = vcmask 261120   ;;  %v500_v38 = vmov 0.0|0.0   ;;  %v300_v59 = vlaneseq }
   0x9   :  { %426 = vmatprep.mubr.msk.f32.mxu0 %vm58_vm0, %v31_v7  ;;  %v32_v10 = vld [vmem:[%s625_s1 + $0x18] sm:$0xff]  ;;  %v168_v12 = vld [vmem:[%s628_s4 + $0x8] sm:$0xff]  ;;  %v169_v13 = vld [vmem:[%s628_s4 + $0x10] sm:$0xff]  ;;  %462 = vmatprep.subr.bf16.mxu0 %v500_v38  ;;  %vm501_vm2 = vmmov 0   ;;  %v502_v39 = vmov 0.0   ;;  %s503_s9 = smov [#allocation3]  }
   0xa   :  { %45 = vperm.xlu0 %473, %v35_v8   ;;  %v170_v14 = vld [vmem:[%s628_s4 + $0x18] sm:$0xff]  ;;  %v294_v15 = vld [vmem:[#allocation2] sm:$0x1]  ;;  %v164_v35 = vld [vmem:[%s627_s3 + $0x8] sm:$0xff]  ;;  %v301_v60 = vshrl.u32 %v300_v59, 7  ;;  %s385_s0 = sshll.u32 %s503_s9, 4  ;;  %s386_s0 = int_to_ptr.vmem [resolvable:$true] %s385_s0 }
   0xb   :  { %55 = vperm.xlu1 %474, %v37_v9   ;;  %v163_v16 = vld [vmem:[%s627_s3] sm:$0xff]  ;;  %v165_v36 = vld [vmem:[%s627_s3 + $0x10] sm:$0xff]  ;;  %v166_v37 = vld [vmem:[%s627_s3 + $0x18] sm:$0xff]  ;;  %vm377_vm3 = vcmask 57344   ;;  %s475_s10 = scalar_lea.vmem %s386_s0, 16  ;;  %s479_s11 = scalar_lea.vmem %s386_s0, 32 }
   0xc   :  { %427 = vmatmul.mubr.msk.f32.gmra.mrb[2].mxu0 %vm58_vm0, %v32_v10  ;;  %437 = vmatprep.mubr.msk.f32.mxu1 %vm191_vm1, %v163_v16  ;;  %v293_v58 = vld [vmem:[%s629_s5] sm:$0x1]  ;;  %v302_v61 = vsub.s32 0, %v301_v60  ;;  %p476_p0 = scmp.ne.s32.totalorder %s386_s0, %s475_s10  ;;  %p480_p1 = scmp.lt.s32.totalorder %s386_s0, %s386_s0 }
   0xd   :  { %451 = vmatprep.mubr.msk.f32.mxu0 %vm501_vm2, %v502_v39  ;;  %p481_p2 = scmp.lt.s32.totalorder %s479_s11, %s475_s10 }
   0xe   :  { %173 = vperm.xlu0 %473, %v167_v11  }
   0xf   :  { %178 = vperm.xlu1 %474, %v168_v12   ;;  %p482_p3 = por %p481_p2, %p480_p1 }
  0x11   :  { %p483_p4 = pnand %p482_p3, %p476_p0 }
  0x12   :  { %183 = vperm.xlu0 %473, %v169_v13  }
  0x13   :  { %188 = vperm.xlu1 %474, %v170_v14  }
  0x16   :  { %297 = vperm.xlu0 %473, %v294_v15  }
  0x85   :  { %v41_v17 = vpop.permute.xlu0 %40 }
  0x86   :  { %v51_v18 = vpop.permute.xlu1 %50 }
  0x89   :  { %v46_v19 = vpop.permute.xlu0 %45 }
  0x8a   :  { %v56_v25 = vpop.permute.xlu1 %55 }
  0x8d   :  { %v174_v41 = vpop.permute.xlu0 %173 }
  0x8e   :  { %v179_v40 = vpop.permute.xlu1 %178 }
  0x91   :  { %v184_v50 = vpop.permute.xlu0 %183 }
  0x92   :  { %v189_v47 = vpop.permute.xlu1 %188 }
  0x95   :  { %v298_v62 = vpop.permute.xlu0 %297 }
  0x96   :  { %v303_v63 = vrot.slane %v298_v62, %v302_v61 }
  0xdb   :  { %v425_v20 = vpop.f32.mrb[0].mxu0 }
  0xdc   :  { %v146_v21 = vadd.f32 %v425_v20, %v46_v19  ;;  %v140_v22 = vpop.f32.mrb[1].mxu0 }
  0xdd   :  { %v141_v23 = vadd.f32 %v140_v22, %v41_v17 }
  0xde   :  { %v160_v24 = vmax.f32 %v146_v21, 0.0 }
  0xdf   :  { %v159_v26 = vmax.f32 %v141_v23, 0.0  ;;  %v428_v27 = vpop.f32.mrb[2].mxu0 }
  0xe0   :  { %v156_v28 = vadd.f32 %v428_v27, %v56_v25  ;;  %v150_v29 = vpop.f32.mrb[3].mxu0 }
  0xe1   :  { %v151_v30 = vadd.f32 %v150_v29, %v51_v18  ;;  %v454_v31 = vpack.c.bf16 %v160_v24, %v159_v26 }
  0xe2   :  { %v162_v32 = vmax.f32 %v156_v28, 0.0 }
  0xe3   :  { %v161_v33 = vmax.f32 %v151_v30, 0.0  ;;  %455 = vmatprep.subr.bf16.mxu1 %v454_v31 }
  0xe4   :  { %457 = vmatpush3.bf16.msra.mxu1 %v454_v31 }
  0xe5   :  { %v458_v34 = vpack.c.bf16 %v162_v32, %v161_v33 }
  0xe7   :  { %459 = vmatprep.subr.bf16.mxu1 %v458_v34 }
  0xe8   :  { %461 = vmatpush3.bf16.msra.mxu1 %v458_v34 }
  0xeb   :  { %438 = vmatmul.mubr.msk.f32.vlgmr.msra.gmra.mrb[0].mxu1 %vm191_vm1, %v164_v35 }
  0xec   :  { %440 = vmatprep.mubr.msk.f32.mxu1 %vm191_vm1, %v165_v36 }
  0xef   :  { %441 = vmatmul.mubr.msk.f32.gmra.mrb[2].mxu1 %vm191_vm1, %v166_v37 }
 0x1be   :  { %v439_v42 = vpop.f32.mrb[0].mxu1 }
 0x1bf   :  { %v276_v43 = vadd.f32 %v439_v42, %v179_v40  ;;  %v270_v44 = vpop.f32.mrb[1].mxu1 }
 0x1c0   :  { %v271_v45 = vadd.f32 %v270_v44, %v174_v41 }
 0x1c1   :  { %v290_v46 = vmax.f32 %v276_v43, 0.0 }
 0x1c2   :  { %v289_v48 = vmax.f32 %v271_v45, 0.0  ;;  %v442_v49 = vpop.f32.mrb[2].mxu1 }
 0x1c3   :  { %v286_v51 = vadd.f32 %v442_v49, %v189_v47  ;;  %v280_v52 = vpop.f32.mrb[3].mxu1 }
 0x1c4   :  { %v463_v53 = vpack.c.bf16 %v290_v46, %v289_v48  ;;  %v281_v54 = vadd.f32 %v280_v52, %v184_v50 }
 0x1c5   :  { %v292_v55 = vmax.f32 %v286_v51, 0.0 }
 0x1c6   :  { %v291_v56 = vmax.f32 %v281_v54, 0.0  ;;  %464 = vmatpush3.bf16.msra.mxu0 %v463_v53 }
 0x1c7   :  { %465 = vmatprep.subr.bf16.mxu0 %v500_v38 }
 0x1c8   :  { %v466_v57 = vpack.c.bf16 %v292_v55, %v291_v56 }
 0x1ca   :  { %467 = vmatpush3.bf16.msra.mxu0 %v466_v57 }
 0x1cd   :  { %452 = vmatmul.mubr.msk.f32.vlgmr.msra.gmra.mrb[4].mxu0 %vm191_vm1, %v293_v58 }
 0x2a0   :  { %v373_v0 = vpop.f32.mrb[4].mxu0 }
 0x2a1   :  { %v374_v1 = vadd.f32 %v373_v0, %v303_v63  ;;  %v453_v2 = vpop.f32.mrb[5].mxu0 }
 0x2a3   :  { %378 = vst.msk [vmem:[#allocation3] sm:$0x1] %vm377_vm3, %v374_v1 }
 0x2a4   :  { %486 = shalt.err (!%p483_p4)
}
 0x2a5   :  { %s487_s13 = scalar_lea.hbm %s631_s7, 16 }
 0x2a6   :  { %p488_p5 = scmp.ne.s32.totalorder %s631_s7, %s487_s13  ;;  %p491_p6 = scmp.lt.u32.totalorder %s487_s13, %s631_s7 }
 0x2a8   :  { %p493_p7 = pnand %p491_p6, %p488_p5 }
 0x2aa   :  { %496 = shalt.err (!%p493_p7)
}
 0x2ab   :  { %388 = dma.vmem_to_hbm [thread:$0]  %s386_s0, 16, %s631_s7, [#allocation4]  }
 0x2ac   :  { %497 = dma.done.wait [#allocation4], 16  }
 0x2ad   :  { %498 = vsyncadd [#allocation4], 4294967280 }
 0x2ae   :  { %392 = vsyncpa [#allocation4], 1 }

</bundles_post_ra>
